<compile_context>
chip_gen: v7x
topology: tpu7x:2x2x1
jax: 0.10.0
libtpu: 0.0.40
codegen_flags: <defaults>
</compile_context>

<pallas_src>
import jax
import jax.numpy as jnp
import numpy as np
from jax.experimental import pallas as pl
from jax.experimental.pallas import tpu as pltpu

GRID = 16                 # small stand-in for grid = 224 (both give g2 % 128 == 0)
LANE = 128
NUM_EMB_STATE = 64 + 2 + 1
SOFT_COEFFICIENT = 1.0    # args.soft_coefficient
NEG_BIG = -10000000000.0


def actor_kernel(scal_ref, planes_ref, probs_ref, cnn_ref):
    """One batch-tile step: folded 1x1 convs + exact mask + row softmax.

    scal_ref  (SMEM, f32[7]): [0:5] folded per-plane coefficients, [5] folded
              bias, [6] net_img global-min threshold (min + soft_coefficient).
    planes_ref (VMEM, f32[TB, 5, SUB, 128]): the 5 channel planes, lane-dense.
    probs_ref / cnn_ref (VMEM, f32[TB, SUB, 128]).
    """
    # Read SMEM scalars once at entry (hoisted broadcasts).
    c0 = scal_ref[0]
    c1 = scal_ref[1]
    c2 = scal_ref[2]
    c3 = scal_ref[3]
    c4 = scal_ref[4]
    cb = scal_ref[5]
    net_thresh = scal_ref[6]

    p0 = planes_ref[:, 0, :, :]
    p1 = planes_ref[:, 1, :, :]
    p2 = planes_ref[:, 2, :, :]
    p3 = planes_ref[:, 3, :, :]
    p4 = planes_ref[:, 4, :, :]

    # cnn -> merge <- cnn_coarse (all 1x1 convs) folded into one affine map.
    merged = c0 * p0 + c1 * p1 + c2 * p2 + c3 * p3 + c4 * p4 + cb
    # Store cnn_res immediately so `merged` (a full-tile f32 temporary) does
    # not stay live across the softmax (reduces peak VMEM per tile).
    cnn_ref[...] = merged

    # Exact reference mask math (no binary-mask assumption):
    #   net_img = p1 + 10*p2 ; mask2 = (net_img > net_min + soft) ;
    #   masked  = (mask + mask2) >= 1.0   with mask = p2.
    mask2 = (p1 + 10.0 * p2 > net_thresh).astype(jnp.float32)
    logits = jnp.where(p2 + mask2 >= 1.0, jnp.float32(NEG_BIG), merged)

    # Single-pass exact softmax over the whole grid*grid row of each sample.
    # exp() is written straight into the output buffer; normalization uses an
    # exact divide on the tiny (TB,1,1) denominator (not on the full tile).
    row_max = jnp.max(logits, axis=(1, 2), keepdims=True)            # (TB,1,1)
    probs_ref[...] = jnp.exp(logits - row_max)                        # EUP
    denom = jnp.sum(probs_ref[...], axis=(1, 2), keepdims=True)       # (TB,1,1)
    probs_ref[...] = probs_ref[...] * (1.0 / denom)


def _pick_batch_tile(batch):
    """Largest tile in (4,2,1) dividing `batch` that keeps >= 2 grid steps.

    >= 2 steps lets v7x shard the "parallel" batch axis across both
    TensorCores (each with its own HBM path); the cap of 4 keeps a
    production-size (GRID=224) tile ~3.8 MiB so the double-buffered working
    set + temporaries stays inside the scoped-VMEM defaults on every
    generation.  (On single-TC v6e, sweeping tb=8 is also reasonable.)
    """
    for t in (4, 2, 1):
        if batch % t == 0 and batch // t >= 2:
            return t
    return 1


def init_params(key):
    """Deterministic parameter init. Shapes follow Actor.__init__."""
    ks = jax.random.split(key, 10)
    g2 = GRID * GRID
    params = {
        # fc1/fc2/fc3 exist in __init__ but are unused by forward().
        "fc1_w": jax.random.normal(ks[0], (512, NUM_EMB_STATE), jnp.float32) * 0.02,
        "fc1_b": jnp.zeros((512,), jnp.float32),
        "fc2_w": jax.random.normal(ks[1], (64, 512), jnp.float32) * 0.02,
        "fc2_b": jnp.zeros((64,), jnp.float32),
        "fc3_w": jax.random.normal(ks[2], (g2, 64), jnp.float32) * 0.02,
        "fc3_b": jnp.zeros((g2,), jnp.float32),
        # synthesized submodules (1x1 convs, 1 output channel each)
        "cnn_w": jax.random.normal(ks[3], (4,), jnp.float32) * 0.5,
        "cnn_b": jax.random.normal(ks[4], (), jnp.float32) * 0.1,
        "coarse_w": jax.random.normal(ks[5], (3,), jnp.float32) * 0.5,
        "coarse_b": jax.random.normal(ks[6], (), jnp.float32) * 0.1,
        # self.merge = nn.Conv2d(2, 1, 1)  -> weight (1,2,1,1), bias (1,)
        "merge_w": jax.random.normal(ks[7], (2,), jnp.float32) * 0.5,
        "merge_b": jax.random.normal(ks[8], (), jnp.float32) * 0.1,
    }
    return params


@jax.jit
def actor_forward(x, wvec):
    """x: (B, 1 + 5*G*G) f32, wvec: (12,) f32.

    wvec layout: [0:4] cnn 1x1 weights, [4] cnn bias, [5:8] coarse weights,
                 [8] coarse bias, [9:11] merge Conv2d(2,1,1) weights, [11] bias.
    Returns (probs (B, G*G), cnn_res (B, 1, G, G)).
    """
    B = x.shape[0]
    g2 = GRID * GRID
    assert g2 % LANE == 0
    sub = g2 // LANE
    tb = _pick_batch_tile(B)

    # Mask threshold: global min of net_img across the whole batch (matches
    # the reference `net_img.min()`).  Computed directly from x so it is one
    # streaming XLA reduction independent of the planes operand.
    net_img = x[:, 1 + g2:1 + 2 * g2] + 10.0 * x[:, 1 + 2 * g2:1 + 3 * g2]
    net_thresh = jnp.min(net_img) + SOFT_COEFFICIENT

    # Fold cnn -> merge <- cnn_coarse into one 5-coefficient affine map:
    # merged = w9*(w0 p1 + w1 p2 + w2 p3 + w3 p4 + w4)
    #        + w10*(w5 p0 + w6 p1 + w7 p3 + w8) + w11
    w = wvec
    scal = jnp.stack([
        w[10] * w[5],                        # p0
        w[9] * w[0] + w[10] * w[6],          # p1
        w[9] * w[1],                         # p2
        w[9] * w[2] + w[10] * w[7],          # p3
        w[9] * w[3],                         # p4
        w[9] * w[4] + w[10] * w[8] + w[11],  # bias
        net_thresh,                          # mask threshold
    ]).astype(jnp.float32)

    # Lane-dense (B, 5, g2/128, 128) view of the 5 planes.  With
    # allow_input_fusion on this operand, XLA folds the slice+reshape into the
    # pallas_call's input DMAs instead of writing a second HBM copy of all
    # 5 planes (the single biggest lever for this bandwidth-bound kernel).
    planes = x[:, 1:1 + 5 * g2].reshape(B, 5, sub, LANE)

    probs3, cnn3 = pl.pallas_call(
        actor_kernel,
        grid=(B // tb,),
        out_shape=(jax.ShapeDtypeStruct((B, sub, LANE), jnp.float32),
                   jax.ShapeDtypeStruct((B, sub, LANE), jnp.float32)),
        in_specs=[
            pl.BlockSpec(memory_space=pltpu.MemorySpace.SMEM),          # scalars
            pl.BlockSpec((tb, 5, sub, LANE), lambda b: (b, 0, 0, 0)),   # planes
        ],
        out_specs=(
            pl.BlockSpec((tb, sub, LANE), lambda b: (b, 0, 0)),
            pl.BlockSpec((tb, sub, LANE), lambda b: (b, 0, 0)),
        ),
        compiler_params=pltpu.CompilerParams(
            dimension_semantics=("parallel",),
            allow_input_fusion=[False, True],
            vmem_limit_bytes=48 * 1024 * 1024,
        ),
        cost_estimate=pl.CostEstimate(
            flops=16 * B * g2,
            transcendentals=B * g2,
            bytes_accessed=7 * B * g2 * 4),
    )(scal, planes)

    probs = probs3.reshape(B, g2)
    cnn_res = cnn3.reshape(B, 1, GRID, GRID)
    return probs, cnn_res


def actor_forward_ref(x, wvec):
    """Pure-JAX reference of the original (unfolded) math, for correctness."""
    B = x.shape[0]
    g2 = GRID * GRID
    p = [x[:, 1 + i * g2: 1 + (i + 1) * g2] for i in range(5)]
    cnn_out = wvec[0] * p[1] + wvec[1] * p[2] + wvec[2] * p[3] + wvec[3] * p[4] + wvec[4]
    coarse_out = wvec[5] * p[0] + wvec[6] * p[1] + wvec[7] * p[3] + wvec[8]
    merged = wvec[9] * cnn_out + wvec[10] * coarse_out + wvec[11]
    mask = p[2]
    net_img = p[1] + p[2] * 10.0
    net_min = jnp.min(net_img) + SOFT_COEFFICIENT
    mask2 = (net_img > net_min).astype(jnp.float32)
    logits = jnp.where(mask + mask2 >= 1.0, jnp.float32(NEG_BIG), merged)
    probs = jax.nn.softmax(logits, axis=-1)
    return probs, merged.reshape(B, 1, GRID, GRID)


if __name__ == "__main__":
    key = jax.random.PRNGKey(0)
    k_params, k_x, k_mask = jax.random.split(key, 3)

    params = init_params(k_params)
    wvec = jnp.concatenate([
        params["cnn_w"], params["cnn_b"][None],
        params["coarse_w"], params["coarse_b"][None],
        params["merge_w"], params["merge_b"][None],
    ]).astype(jnp.float32)  # (12,)

    B = 2
    g2 = GRID * GRID
    # State vector: leading scalar + 5 planes.  Plane 2 (the mask plane) is
    # binary, as in the maskplace environment, exercising both mask branches.
    x = jax.random.uniform(k_x, (B, 1 + 5 * g2), jnp.float32)
    mask_plane = (jax.random.uniform(k_mask, (B, g2)) > 0.7).astype(jnp.float32)
    x = x.at[:, 1 + 2 * g2: 1 + 3 * g2].set(mask_plane)

    probs, cnn_res = actor_forward(x, wvec)
    jax.block_until_ready((probs, cnn_res))

    probs_ref, cnn_ref = actor_forward_ref(x, wvec)
    # Tolerances allow for the folded-coefficient rounding-order difference.
    np.testing.assert_allclose(np.asarray(probs), np.asarray(probs_ref),
                               rtol=1e-4, atol=1e-6)
    np.testing.assert_allclose(np.asarray(cnn_res), np.asarray(cnn_ref),
                               rtol=1e-4, atol=1e-5)
    assert probs.shape == (B, g2) and cnn_res.shape == (B, 1, GRID, GRID)
    # each softmax row sums to 1 (exact scalar divide in the kernel)
    np.testing.assert_allclose(np.asarray(jnp.sum(probs, axis=-1)),
                               np.ones(B), rtol=1e-5, atol=1e-5)

    print("KERNEL_OK")
</pallas_src>

<mosaic_0001>
module attributes {stable_mosaic.version = 11 : i64} {
  func.func @actor_kernel(%arg0: i32, %arg1: memref<7xf32, #tpu.memory_space<smem>>, %arg2: memref<1x5x2x128xf32, #tpu.memory_space<vmem>>, %arg3: memref<1x2x128xf32, #tpu.memory_space<vmem>>, %arg4: memref<1x2x128xf32, #tpu.memory_space<vmem>>) attributes {dimension_semantics = [#tpu.dimension_semantics<parallel>], iteration_bounds = array<i64: 2>, scalar_prefetch = 0 : i64, scratch_operands = 0 : i64, tpu.core_type = #tpu.core_type<tc>, window_params = [{transform_indices = @transform_0, window_bounds = array<i64: 7>}, {transform_indices = @transform_1, window_bounds = array<i64: 1, 5, 2, 128>}, {transform_indices = @transform_2, window_bounds = array<i64: 1, 2, 128>}, {transform_indices = @transform_3, window_bounds = array<i64: 1, 2, 128>}]} {
    %c0 = arith.constant 0 : index
    %0 = memref.load %arg1[%c0] : memref<7xf32, #tpu.memory_space<smem>>
    %c1 = arith.constant 1 : index
    %1 = memref.load %arg1[%c1] : memref<7xf32, #tpu.memory_space<smem>>
    %c2 = arith.constant 2 : index
    %2 = memref.load %arg1[%c2] : memref<7xf32, #tpu.memory_space<smem>>
    %c3 = arith.constant 3 : index
    %3 = memref.load %arg1[%c3] : memref<7xf32, #tpu.memory_space<smem>>
    %c4 = arith.constant 4 : index
    %4 = memref.load %arg1[%c4] : memref<7xf32, #tpu.memory_space<smem>>
    %c5 = arith.constant 5 : index
    %5 = memref.load %arg1[%c5] : memref<7xf32, #tpu.memory_space<smem>>
    %c6 = arith.constant 6 : index
    %6 = memref.load %arg1[%c6] : memref<7xf32, #tpu.memory_space<smem>>
    %c0_0 = arith.constant 0 : index
    %c0_1 = arith.constant 0 : index
    %c0_2 = arith.constant 0 : index
    %c0_3 = arith.constant 0 : index
    %7 = vector.load %arg2[%c0_0, %c0_1, %c0_2, %c0_3] : memref<1x5x2x128xf32, #tpu.memory_space<vmem>>, vector<1x1x2x128xf32>
    %8 = vector.shape_cast %7 : vector<1x1x2x128xf32> to vector<1x2x128xf32>
    %c0_4 = arith.constant 0 : index
    %c1_5 = arith.constant 1 : index
    %c0_6 = arith.constant 0 : index
    %c0_7 = arith.constant 0 : index
    %9 = vector.load %arg2[%c0_4, %c1_5, %c0_6, %c0_7] : memref<1x5x2x128xf32, #tpu.memory_space<vmem>>, vector<1x1x2x128xf32>
    %10 = vector.shape_cast %9 : vector<1x1x2x128xf32> to vector<1x2x128xf32>
    %c0_8 = arith.constant 0 : index
    %c2_9 = arith.constant 2 : index
    %c0_10 = arith.constant 0 : index
    %c0_11 = arith.constant 0 : index
    %11 = vector.load %arg2[%c0_8, %c2_9, %c0_10, %c0_11] : memref<1x5x2x128xf32, #tpu.memory_space<vmem>>, vector<1x1x2x128xf32>
    %12 = vector.shape_cast %11 : vector<1x1x2x128xf32> to vector<1x2x128xf32>
    %c0_12 = arith.constant 0 : index
    %c3_13 = arith.constant 3 : index
    %c0_14 = arith.constant 0 : index
    %c0_15 = arith.constant 0 : index
    %13 = vector.load %arg2[%c0_12, %c3_13, %c0_14, %c0_15] : memref<1x5x2x128xf32, #tpu.memory_space<vmem>>, vector<1x1x2x128xf32>
    %14 = vector.shape_cast %13 : vector<1x1x2x128xf32> to vector<1x2x128xf32>
    %c0_16 = arith.constant 0 : index
    %c4_17 = arith.constant 4 : index
    %c0_18 = arith.constant 0 : index
    %c0_19 = arith.constant 0 : index
    %15 = vector.load %arg2[%c0_16, %c4_17, %c0_18, %c0_19] : memref<1x5x2x128xf32, #tpu.memory_space<vmem>>, vector<1x1x2x128xf32>
    %16 = vector.shape_cast %15 : vector<1x1x2x128xf32> to vector<1x2x128xf32>
    %17 = vector.broadcast %0 : f32 to vector<1x2x128xf32>
    %18 = arith.mulf %17, %8 : vector<1x2x128xf32>
    %19 = vector.broadcast %1 : f32 to vector<1x2x128xf32>
    %20 = arith.mulf %19, %10 : vector<1x2x128xf32>
    %21 = arith.addf %18, %20 : vector<1x2x128xf32>
    %22 = vector.broadcast %2 : f32 to vector<1x2x128xf32>
    %23 = arith.mulf %22, %12 : vector<1x2x128xf32>
    %24 = arith.addf %21, %23 : vector<1x2x128xf32>
    %25 = vector.broadcast %3 : f32 to vector<1x2x128xf32>
    %26 = arith.mulf %25, %14 : vector<1x2x128xf32>
    %27 = arith.addf %24, %26 : vector<1x2x128xf32>
    %28 = vector.broadcast %4 : f32 to vector<1x2x128xf32>
    %29 = arith.mulf %28, %16 : vector<1x2x128xf32>
    %30 = arith.addf %27, %29 : vector<1x2x128xf32>
    %31 = vector.broadcast %5 : f32 to vector<1x2x128xf32>
    %32 = arith.addf %30, %31 : vector<1x2x128xf32>
    %c0_20 = arith.constant 0 : index
    %c0_21 = arith.constant 0 : index
    %c0_22 = arith.constant 0 : index
    %33 = vector.load %arg4[%c0_20, %c0_21, %c0_22] : memref<1x2x128xf32, #tpu.memory_space<vmem>>, vector<1x2x128xf32>
    tpu.vector_store %arg4[%c0_20, %c0_21, %c0_22], %32 {strides = array<i32>} : memref<1x2x128xf32, #tpu.memory_space<vmem>>, vector<1x2x128xf32>,
    %cst = arith.constant 1.000000e+01 : f32
    %34 = vector.broadcast %cst : f32 to vector<1x2x128xf32>
    %35 = arith.mulf %34, %12 : vector<1x2x128xf32>
    %36 = arith.addf %10, %35 : vector<1x2x128xf32>
    %37 = vector.broadcast %6 : f32 to vector<1x2x128xf32>
    %38 = arith.cmpf ogt, %36, %37 : vector<1x2x128xf32>
    %39 = arith.extui %38 : vector<1x2x128xi1> to vector<1x2x128xi32>
    %40 = arith.sitofp %39 : vector<1x2x128xi32> to vector<1x2x128xf32>
    %41 = arith.addf %12, %40 : vector<1x2x128xf32>
    %cst_23 = arith.constant 1.000000e+00 : f32
    %42 = vector.broadcast %cst_23 : f32 to vector<1x2x128xf32>
    %43 = arith.cmpf oge, %41, %42 : vector<1x2x128xf32>
    %cst_24 = arith.constant -1.000000e+10 : f32
    %44 = vector.broadcast %cst_24 : f32 to vector<1x2x128xf32>
    %45 = arith.select %43, %44, %32 : vector<1x2x128xi1>, vector<1x2x128xf32>
    %cst_25 = arith.constant dense<0xFF800000> : vector<1xf32>
    %46 = vector.multi_reduction <maximumf>, %45, %cst_25 [1, 2] : vector<1x2x128xf32> to vector<1xf32>
    %47 = vector.shape_cast %46 : vector<1xf32> to vector<1x1x1xf32>
    %48 = vector.broadcast %47 : vector<1x1x1xf32> to vector<1x2x128xf32>
    %49 = arith.subf %45, %48 : vector<1x2x128xf32>
    %50 = math.exp %49 : vector<1x2x128xf32>
    %c0_26 = arith.constant 0 : index
    %c0_27 = arith.constant 0 : index
    %c0_28 = arith.constant 0 : index
    %51 = vector.load %arg3[%c0_26, %c0_27, %c0_28] : memref<1x2x128xf32, #tpu.memory_space<vmem>>, vector<1x2x128xf32>
    tpu.vector_store %arg3[%c0_26, %c0_27, %c0_28], %50 {strides = array<i32>} : memref<1x2x128xf32, #tpu.memory_space<vmem>>, vector<1x2x128xf32>,
    %c0_29 = arith.constant 0 : index
    %c0_30 = arith.constant 0 : index
    %c0_31 = arith.constant 0 : index
    %52 = vector.load %arg3[%c0_29, %c0_30, %c0_31] : memref<1x2x128xf32, #tpu.memory_space<vmem>>, vector<1x2x128xf32>
    %cst_32 = arith.constant dense<0.000000e+00> : vector<1xf32>
    %53 = vector.multi_reduction <add>, %52, %cst_32 [1, 2] : vector<1x2x128xf32> to vector<1xf32>
    %54 = vector.shape_cast %53 : vector<1xf32> to vector<1x1x1xf32>
    %c0_33 = arith.constant 0 : index
    %c0_34 = arith.constant 0 : index
    %c0_35 = arith.constant 0 : index
    %55 = vector.load %arg3[%c0_33, %c0_34, %c0_35] : memref<1x2x128xf32, #tpu.memory_space<vmem>>, vector<1x2x128xf32>
    %cst_36 = arith.constant 1.000000e+00 : f32
    %56 = vector.broadcast %cst_36 : f32 to vector<1x1x1xf32>
    %57 = arith.divf %56, %54 : vector<1x1x1xf32>
    %58 = vector.broadcast %57 : vector<1x1x1xf32> to vector<1x2x128xf32>
    %59 = arith.mulf %55, %58 : vector<1x2x128xf32>
    %c0_37 = arith.constant 0 : index
    %c0_38 = arith.constant 0 : index
    %c0_39 = arith.constant 0 : index
    %60 = vector.load %arg3[%c0_37, %c0_38, %c0_39] : memref<1x2x128xf32, #tpu.memory_space<vmem>>, vector<1x2x128xf32>
    tpu.vector_store %arg3[%c0_37, %c0_38, %c0_39], %59 {strides = array<i32>} : memref<1x2x128xf32, #tpu.memory_space<vmem>>, vector<1x2x128xf32>,
    return
  }
  func.func @transform_0(%arg0: i32) -> i32 {
    %c0_i32 = arith.constant 0 : i32
    %c0_i32_0 = arith.constant 0 : i32
    return %c0_i32 : i32
  }
  func.func @transform_1(%arg0: i32) -> (i32, i32, i32, i32) {
    %c0_i32 = arith.constant 0 : i32
    %c0_i32_0 = arith.constant 0 : i32
    %c0_i32_1 = arith.constant 0 : i32
    %c0_i32_2 = arith.constant 0 : i32
    return %arg0, %c0_i32, %c0_i32_0, %c0_i32_1 : i32, i32, i32, i32
  }
  func.func @transform_2(%arg0: i32) -> (i32, i32, i32) {
    %c0_i32 = arith.constant 0 : i32
    %c0_i32_0 = arith.constant 0 : i32
    %c0_i32_1 = arith.constant 0 : i32
    return %arg0, %c0_i32, %c0_i32_0 : i32, i32, i32
  }
  func.func @transform_3(%arg0: i32) -> (i32, i32, i32) {
    %c0_i32 = arith.constant 0 : i32
    %c0_i32_0 = arith.constant 0 : i32
    %c0_i32_1 = arith.constant 0 : i32
    return %arg0, %c0_i32, %c0_i32_0 : i32, i32, i32
  }
}

</mosaic_0001>

<bundles_post_ra>
// kernel: actor_forward.1
= control target key start
LH: loop header
LB: loop body
LE: loop exit
PB: predicated region body
PF: predicated region fallthrough
CT: control target
= control target key end

     0   :  { %9 = vsyncpa [#allocation3], 0  ;;  %s457_s12 = smov 0   ;;  %s500_s0 = inlined_call_operand.vmem [shape: f32[7], index: 0, kind: input, shape index: {}]   ;;  %s501_s1 = inlined_call_operand.vmem [shape: f32[2,5,2,128], index: 1, kind: input, shape index: {}]   ;;  %s502_s2 = inlined_call_operand.vmem [shape: f32[2,2,128], index: 2, kind: output, shape index: {0}]   ;;  %s503_s3 = inlined_call_operand.vmem [shape: f32[2,2,128], index: 3, kind: output, shape index: {1}]  }
   0x1 LB: > { %s360_s13 = sadd.s32 4294967295, %s433_s12   ;;  %p362_p0 = scmp.ge.s32.totalorder %s433_s12, 1  ;;  %s433_s12 = sphi %s457_s12, %s15_s12  }
   0x2   : > { %p119_p1 = scmp.lt.s32.totalorder %s433_s12, 3  ;;  %s132_s16 = sshll.u32 %s500_s0, 4  ;;  %s133_s16 = int_to_ptr.vmem [resolvable:$true] %s132_s16 }
   0x3   : > { %p392_p3 = scmp.eq.s32.totalorder %s360_s13, 0  ;;  %s408_s18 = scalar_lea.vmem %s133_s16, 16 }
   0x4   : > { %p468_p2 = pnand %p362_p0, %p119_p1  ;;  %p409_p6 = scmp.ne.s32.totalorder %s133_s16, %s408_s18 }
   0x5   : > { %p416_p10 = scmp.lt.s32.totalorder %s133_s16, %s133_s16  ;;  %p417_p11 = scmp.lt.s32.totalorder %s408_s18, %s408_s18 }
   0x6   : > { %p388_p4 = pneg %p468_p2 }
   0x7   : > { %p418_p12 = por %p417_p11, %p416_p10 }
   0x8   : > { %p389_p5 = pnand %p392_p3, %p388_p4 }
   0xa   : > { %p410_p7 = pneg %p389_p5 }
   0xc   : > { %p411_p8 = pnand %p410_p7, %p409_p6 }
   0xe   : > { %p412_p9 = pneg %p411_p8 }
  0x10   : > { %p419_p13 = pnand %p418_p12, %p412_p9 }
  0x12   : > { %422 = shalt.err (!%p419_p13)
}
  0x13   : > { %s435_s19 = smov [#allocation2]   ;;  %153 = sbr.rel (%p468_p2) target bundleno = 397 (0x18d), region = 28 }
  0x14   : > { %391 = dma.vmem_to_smem (!%p389_p5), %s133_s16, 16, %s435_s19, [#allocation3]  }
  0x1a   : > { %428 = dma.done.wait (%p392_p3), [#allocation3], 16  }
  0x1b   : > { %430 = vsyncadd (%p392_p3), [#allocation3], 4294967280 }
  0x1c   : > { %159 = sfence }
  0x1d   : > { %p181_p0 = scmp.lt.s32.totalorder %s360_s13, 1  ;;  %s194_s20 = sld [smem:[#allocation2]]  ;;  %v436_v21 = vmov 0.0   ;;  %vm236_vm2 = vcmask 1041408  }
  0x1e   : > { %s370_s21 = sld [smem:[#allocation2 + $0x1]]  ;;  %s371_s22 = sld [smem:[#allocation2 + $0x2]] }
  0x1f   : > { %s506_s13 = smov (!%p181_p0, %s360_s13), 1  ;;  %s372_s23 = sld [smem:[#allocation2 + $0x3]] }
  0x20   : > { %s373_s24 = sld [smem:[#allocation2 + $0x4]]  ;;  %s383_s25 = smul.u32 10, %s506_s13 }
  0x21   : > { %s482_s26 = sld [smem:[#allocation2 + $0x5]]  ;;  %s375_s30 = sld [smem:[#allocation2 + $0x6]] }
  0x22   : > { %s185_s29 = scalar_lea.vmem %s501_s1, %s383_s25  ;;  %s368_s4 = sshll.u32 %s506_s13, 1 }
  0x23   : > { %v210_v0 = vstv %s194_s20  ;;  %v201_v1 = vld [vmem:[%s185_s29] sm:$0x3]  ;;  %v376_v2 = vld [vmem:[%s185_s29 + $0x2] sm:$0x3]  ;;  %v377_v3 = vld [vmem:[%s185_s29 + $0x4] sm:$0x3]  ;;  %s193_s7 = scalar_lea.vmem %s503_s3, %s368_s4  ;;  %s189_s10 = scalar_lea.vmem %s502_s2, %s368_s4 }
  0x24   : > { %v212_v4 = vstv %s370_s21  ;;  %v378_v5 = vld [vmem:[%s185_s29 + $0x6] sm:$0x3]  ;;  %v211_v6 = vmul.f32 %v210_v0, %v201_v1  ;;  %v215_v8 = vstv %s371_s22  ;;  %v227_v9 = vmul.f32 10.0, %v377_v3  ;;  %v379_v10 = vld [vmem:[%s185_s29 + $0x8] sm:$0x3] }
  0x25   : > { %v213_v7 = vmul.f32 %v376_v2, %v212_v4  ;;  %v216_v11 = vmul.f32 %v377_v3, %v215_v8  ;;  %v218_v12 = vstv %s372_s23 }
  0x26   : > { %v221_v13 = vstv %s373_s24  ;;  %v219_v15 = vmul.f32 %v378_v5, %v218_v12  ;;  %v228_v16 = vadd.f32 %v376_v2, %v227_v9 }
  0x27   : > { %v214_v14 = vadd.f32 %v213_v7, %v211_v6  ;;  %v222_v18 = vmul.f32 %v379_v10, %v221_v13  ;;  %v229_v19 = vstv %s375_s30  ;;  %v224_v23 = vstv %s482_s26 }
  0x28   : > { %vm230_vm0 = vcmp.gt.f32.partialorder %v228_v16, %v229_v19 }
  0x29   : > { %v217_v17 = vadd.f32 %v216_v11, %v214_v14  ;;  %v380_v22 = vsel %vm230_vm0, 1.0, %v436_v21 }
  0x2a   : > { %v233_v24 = vadd.f32 %v380_v22, %v377_v3 }
  0x2b   : > { %v220_v20 = vadd.f32 %v219_v15, %v217_v17 }
  0x2c   : > { %vm234_vm1 = vcmp.ge.f32.partialorder %v233_v24, 1.0 }
  0x2d   : > { %v223_v25 = vadd.f32 %v222_v18, %v220_v20 }
  0x2f   : > { %v225_v26 = vadd.f32 %v224_v23, %v223_v25 }
  0x31   : > { %v235_v27 = vsel %vm234_vm1, -1e+10, %v225_v26  ;;  %226 = vst [vmem:[%s193_s7] sm:$0x3] %v225_v26 }
  0x32   : > { %v237_v28 = vsel %vm236_vm2, %v235_v27, -inf }
  0x33   : > { %238 = vmax.xlane.f32.xlu0 %v237_v28 }
  0xc0   : > { %v239_v29 = vpop.xlane.xlu0 %238 }
  0xc1   : > { %v240_v30 = vrot.slane %v239_v29, 4 }
  0xc3   : > { %v241_v31 = vmax.f32 %v239_v29, %v240_v30 }
  0xc5   : > { %v242_v32 = vrot.slane %v241_v31, 2 }
  0xc7   : > { %v243_v33 = vmax.f32 %v241_v31, %v242_v32 }
  0xc9   : > { %v244_v34 = vrot.slane %v243_v33, 1 }
  0xcb   : > { %v245_v35 = vmax.f32 %v243_v33, %v244_v34 }
  0xcd   : > { %v246_v36 = vsub.f32 %v235_v27, %v245_v35 }
  0xcf   : > { %v247_v37 = vmul.f32 1.442695, %v246_v36 }
  0xd1   : > { %404 = vpow2.f32 %v247_v37 }
  0xdb   : > { %v405_v38 = vpop.eup %404 }
  0xdc   : > { %249 = vst [vmem:[%s189_s10] sm:$0x3] %v405_v38 }
  0xe3   : > { %v250_v39 = vld [vmem:[%s189_s10] sm:$0x3] }
  0xe4   : > { %v251_v40 = vsel %vm236_vm2, %v250_v39, 0.0 }
  0xe5   : > { %252 = vadd.xlane.f32.xlu0 %v251_v40 }
 0x172   : > { %v253_v41 = vpop.xlane.xlu0 %252 }
 0x173   : > { %v254_v42 = vrot.slane %v253_v41, 4 }
 0x175   : > { %v255_v43 = vadd.f32 %v254_v42, %v253_v41 }
 0x177   : > { %v256_v44 = vrot.slane %v255_v43, 2 }
 0x179   : > { %v257_v45 = vadd.f32 %v256_v44, %v255_v43 }
 0x17b   : > { %v258_v46 = vrot.slane %v257_v45, 1 }
 0x17d   : > { %v259_v47 = vadd.f32 %v258_v46, %v257_v45 }
 0x17f   : > { %406 = vrcp.f32 %v259_v47 }
 0x189   : > { %v407_v48 = vpop.eup %406 }
 0x18a   : > { %v262_v49 = vmul.f32 %v407_v48, %v250_v39 }
 0x18c   : > { %263 = vst [vmem:[%s189_s10] sm:$0x3] %v262_v49 }
 0x18d PF: > { %s15_s12 = sadd.s32 1, %s433_s12  }
 0x18e   : > { %p12_p1 = scmp.ge.s32.totalorder %s15_s12, 4  }
 0x190   :  { %14 = sbr.rel (!%p12_p1) target bundleno = 1 (0x1), region = 79 }
 0x197   :  { %297 = vsyncpa [#allocation3], 1 }
 0x198   :  { %299 = vsyncpa [#allocation3 + $0x1], 1 }

</bundles_post_ra>
